<compile_context>
chip_gen: v7x
topology: tpu7x:2x2x1
jax: 0.10.0
libtpu: 0.0.40
codegen_flags: <defaults>
</compile_context>

<pallas_src>
import functools

import jax
import jax.numpy as jnp
from jax.experimental import pallas as pl
from jax.experimental.pallas import tpu as pltpu


def _round_up(x, m):
    return (x + m - 1) // m * m


def _ls_ce_kernel(logits_ref, targets_ref, out_ref, *, epsilon, num_classes):
    x = logits_ref[...]                                       # (TB, C), native dtype
    tb, c = x.shape

    # Row max on the native dtype (exact: max commutes with the widening cast).
    m = jnp.max(x, axis=-1, keepdims=True)                    # (TB, 1)

    # Shifted f32 rows; the only (TB, C)-sized f32 value in the kernel.
    y = x.astype(jnp.float32) - m.astype(jnp.float32)         # (TB, C) f32

    eps_over_c = float(epsilon) / float(num_classes)
    one_minus_eps = 1.0 - float(epsilon)

    # Fused smoothing + NLL weights (one-hot gather done via iota compare).
    col_ids = jax.lax.broadcasted_iota(jnp.int32, (tb, c), 1)
    tgt = targets_ref[...]                                     # (TB, 1) int32
    w = jnp.where(col_ids == tgt, eps_over_c + one_minus_eps, eps_over_c)

    sum_exp = jnp.sum(jnp.exp(y), axis=-1)                     # (TB,)
    wsum = jnp.sum(w * y, axis=-1)                             # (TB,)
    fused = jnp.log(sum_exp) - wsum                            # (TB,) f32

    # Lane-dense store: (1, TB) block -> unmasked stores / dense writeback.
    out_ref[...] = fused[None, :]


def label_smoothing_cross_entropy(logits, targets, *, epsilon=0.1, reduction="mean"):
    """logits: (B, C) float array (f32 or bf16); targets: (B,) int array.

    Returns scalar f32 for reduction in {'mean', 'sum'}, per-sample (B,) f32 otherwise.
    """
    B, C = logits.shape
    targets2d = targets.astype(jnp.int32).reshape(B, 1)

    # Batch-tile size from a VMEM byte budget computed on the lane-padded
    # footprint: 2x native input tile (double buffer) + ~2x f32 working set
    # (shifted rows + elementwise temps).  A 16 MiB budget with a 32 MiB scoped
    # limit is safe on v5e/v6e (128 MiB phys VMEM) and v7x (64 MiB phys).
    lane_c = _round_up(C, 128)
    row_in = lane_c * jnp.dtype(logits.dtype).itemsize
    row_f32 = lane_c * 4
    budget = 16 * 1024 * 1024
    tb_max = max(8, budget // (2 * row_in + 2 * row_f32))

    if B <= tb_max:
        tb = _round_up(B, 8)                      # single tile: block == full dim
    else:
        tb = max(128, (tb_max // 128) * 128)      # multiple of 128 (lane-dense out)
    B_pad = _round_up(B, tb)

    if B_pad != B:
        logits = jnp.pad(logits, ((0, B_pad - B), (0, 0)))
        targets2d = jnp.pad(targets2d, ((0, B_pad - B), (0, 0)))

    kernel = functools.partial(_ls_ce_kernel, epsilon=float(epsilon), num_classes=C)

    per_row = pl.pallas_call(
        kernel,
        out_shape=jax.ShapeDtypeStruct((1, B_pad), jnp.float32),
        grid=(B_pad // tb,),
        in_specs=[
            pl.BlockSpec((tb, C), lambda i: (i, 0)),
            pl.BlockSpec((tb, 1), lambda i: (i, 0)),
        ],
        out_specs=pl.BlockSpec((1, tb), lambda i: (0, i)),
        compiler_params=pltpu.CompilerParams(
            dimension_semantics=("parallel",),
            vmem_limit_bytes=32 * 1024 * 1024,
        ),
    )(logits, targets2d)

    per_row = per_row[0, :B]
    if reduction == "mean":
        return jnp.mean(per_row)
    if reduction == "sum":
        return jnp.sum(per_row)
    # reduction='none': per-sample linear combination, like the PyTorch module.
    return per_row


def _reference(logits, targets, epsilon=0.1, reduction="mean"):
    # Pure-JAX reference mirroring the PyTorch module.
    logp = jax.nn.log_softmax(logits.astype(jnp.float32), axis=-1)
    n = logits.shape[-1]
    smooth = -jnp.sum(logp, axis=-1)
    nll = -jnp.take_along_axis(logp, targets.astype(jnp.int32)[:, None], axis=-1)[:, 0]
    if reduction == "mean":
        smooth, nll = smooth.mean(), nll.mean()
    elif reduction == "sum":
        smooth, nll = smooth.sum(), nll.sum()
    return epsilon * (smooth / n) + (1.0 - epsilon) * nll


if __name__ == "__main__":
    key = jax.random.PRNGKey(0)
    k1, k2, k3, k4, k5, k6 = jax.random.split(key, 6)

    # 1) Small classifier-head shapes, f32, mean reduction.
    B, C = 8, 16
    logits = jax.random.normal(k1, (B, C), dtype=jnp.float32)
    targets = jax.random.randint(k2, (B,), 0, C, dtype=jnp.int32)
    out = jax.block_until_ready(
        label_smoothing_cross_entropy(logits, targets, epsilon=0.1, reduction="mean")
    )
    ref = _reference(logits, targets, epsilon=0.1, reduction="mean")
    assert jnp.allclose(out, ref, rtol=1e-5, atol=1e-5), (out, ref)

    # 2) Batch padding (B not a multiple of 8), bf16 input, sum reduction.
    B2, C2 = 13, 24
    logits2 = jax.random.normal(k3, (B2, C2), dtype=jnp.bfloat16)
    targets2 = jax.random.randint(k4, (B2,), 0, C2, dtype=jnp.int32)
    out2 = jax.block_until_ready(
        label_smoothing_cross_entropy(logits2, targets2, epsilon=0.1, reduction="sum")
    )
    ref2 = _reference(logits2, targets2, epsilon=0.1, reduction="sum")
    assert jnp.allclose(out2, ref2, rtol=1e-3, atol=1e-3), (out2, ref2)

    # 3) C not a multiple of 128 (exercises lane-padding masking), 'none' reduction.
    B3, C3 = 8, 200
    logits3 = jax.random.normal(k5, (B3, C3), dtype=jnp.float32)
    targets3 = jax.random.randint(k6, (B3,), 0, C3, dtype=jnp.int32)
    out3 = jax.block_until_ready(
        label_smoothing_cross_entropy(logits3, targets3, epsilon=0.1, reduction="none")
    )
    ref3 = _reference(logits3, targets3, epsilon=0.1, reduction="none")
    assert jnp.allclose(out3, ref3, rtol=1e-5, atol=1e-5), (out3, ref3)

    print("KERNEL_OK")
</pallas_src>

<mosaic_0001>
module attributes {stable_mosaic.version = 11 : i64} {
  func.func @_ls_ce_kernel(%arg0: i32, %arg1: memref<8x16xf32, #tpu.memory_space<vmem>>, %arg2: memref<8x1xi32, #tpu.memory_space<vmem>>, %arg3: memref<1x8xf32, #tpu.memory_space<vmem>>) attributes {dimension_semantics = [#tpu.dimension_semantics<parallel>], iteration_bounds = array<i64: 1>, scalar_prefetch = 0 : i64, scratch_operands = 0 : i64, tpu.core_type = #tpu.core_type<tc>, window_params = [{transform_indices = @transform_0, window_bounds = array<i64: 8, 16>}, {transform_indices = @transform_1, window_bounds = array<i64: 8, 1>}, {transform_indices = @transform_2, window_bounds = array<i64: 1, 8>}]} {
    %c0 = arith.constant 0 : index
    %c0_0 = arith.constant 0 : index
    %0 = vector.load %arg1[%c0, %c0_0] : memref<8x16xf32, #tpu.memory_space<vmem>>, vector<8x16xf32>
    %cst = arith.constant dense<0xFF800000> : vector<8xf32>
    %1 = vector.multi_reduction <maximumf>, %0, %cst [1] : vector<8x16xf32> to vector<8xf32>
    %2 = vector.shape_cast %1 : vector<8xf32> to vector<8x1xf32>
    %3 = vector.broadcast %2 : vector<8x1xf32> to vector<8x16xf32>
    %4 = arith.subf %0, %3 : vector<8x16xf32>
    %5 = tpu.iota {dimensions = array<i32: 1>} : vector<8x16xi32>
    %c0_1 = arith.constant 0 : index
    %c0_2 = arith.constant 0 : index
    %6 = vector.load %arg2[%c0_1, %c0_2] : memref<8x1xi32, #tpu.memory_space<vmem>>, vector<8x1xi32>
    %7 = vector.broadcast %6 : vector<8x1xi32> to vector<8x16xi32>
    %8 = arith.cmpi eq, %5, %7 : vector<8x16xi32>
    %cst_3 = arith.constant 9.062500e-01 : f32
    %cst_4 = arith.constant 6.250000e-03 : f32
    %9 = vector.broadcast %cst_3 : f32 to vector<8x16xf32>
    %10 = vector.broadcast %cst_4 : f32 to vector<8x16xf32>
    %11 = arith.select %8, %9, %10 : vector<8x16xi1>, vector<8x16xf32>
    %12 = math.exp %4 : vector<8x16xf32>
    %cst_5 = arith.constant dense<0.000000e+00> : vector<8xf32>
    %13 = vector.multi_reduction <add>, %12, %cst_5 [1] : vector<8x16xf32> to vector<8xf32>
    %14 = arith.mulf %11, %4 : vector<8x16xf32>
    %cst_6 = arith.constant dense<0.000000e+00> : vector<8xf32>
    %15 = vector.multi_reduction <add>, %14, %cst_6 [1] : vector<8x16xf32> to vector<8xf32>
    %16 = math.log %13 : vector<8xf32>
    %17 = arith.subf %16, %15 : vector<8xf32>
    %18 = vector.shape_cast %17 : vector<8xf32> to vector<1x8xf32>
    %c0_7 = arith.constant 0 : index
    %c0_8 = arith.constant 0 : index
    %19 = vector.load %arg3[%c0_7, %c0_8] : memref<1x8xf32, #tpu.memory_space<vmem>>, vector<1x8xf32>
    tpu.vector_store %arg3[%c0_7, %c0_8], %18 {strides = array<i32>} : memref<1x8xf32, #tpu.memory_space<vmem>>, vector<1x8xf32>,
    return
  }
  func.func @transform_0(%arg0: i32) -> (i32, i32) {
    %c0_i32 = arith.constant 0 : i32
    %c0_i32_0 = arith.constant 0 : i32
    return %arg0, %c0_i32 : i32, i32
  }
  func.func @transform_1(%arg0: i32) -> (i32, i32) {
    %c0_i32 = arith.constant 0 : i32
    %c0_i32_0 = arith.constant 0 : i32
    return %arg0, %c0_i32 : i32, i32
  }
  func.func @transform_2(%arg0: i32) -> (i32, i32) {
    %c0_i32 = arith.constant 0 : i32
    %c0_i32_0 = arith.constant 0 : i32
    return %c0_i32, %arg0 : i32, i32
  }
}

</mosaic_0001>

<bundles_post_ra>
// kernel: tpu_custom_call.1
= control target key start
LH: loop header
LB: loop body
LE: loop exit
PB: predicated region body
PF: predicated region fallthrough
CT: control target
= control target key end

     0   :  { %vm13_vm0 = vcmask 130048   ;;  %s131_s0 = inlined_call_operand.vmem [shape: f32[8,16], index: 0, kind: input, shape index: {}]   ;;  %s132_s1 = inlined_call_operand.vmem [shape: s32[8,1], index: 1, kind: input, shape index: {}]   ;;  %s133_s2 = inlined_call_operand.hbm [shape: f32[1,8], index: 2, kind: output, shape index: {}]  }
   0x1   :  { %v12_v0 = vld [vmem:[%s131_s0] sm:$0xff] }
   0x2   :  { %7 = vsyncpa [#allocation3], 0  ;;  %v14_v1 = vsel %vm13_vm0, %v12_v0, -inf  ;;  %v92_v2 = vmov 0   ;;  %v20_v3 = vld [vmem:[%s132_s1] sm:$0xff]  ;;  %v18_v6 = vlaneseq  ;;  %s94_s0 = smov [#allocation2]  }
   0x3   :  { %63 = vset.pattern.permute.xlu0 %v92_v2  ;;  %v93_v10 = vmov 0.00625   ;;  %s52_s1 = sshll.u32 %s94_s0, 4  ;;  %vm44_vm2 = vcmask 57344   ;;  %s53_s1 = int_to_ptr.vmem [resolvable:$true] %s52_s1 }
   0x4   :  { %15 = vmax.xlane.f32.xlu0 %v14_v1  ;;  %v19_v8 = vand.u32 127, %v18_v6  ;;  %v40_v17 = vshrl.u32 %v18_v6, 7  ;;  %s68_s13 = scalar_lea.vmem %s53_s1, 16  ;;  %s72_s14 = scalar_lea.vmem %s53_s1, 32 }
   0x5   :  { %p69_p0 = scmp.ne.s32.totalorder %s53_s1, %s68_s13  ;;  %p73_p1 = scmp.lt.s32.totalorder %s53_s1, %s53_s1 }
   0x6   :  { %v41_v20 = vsub.s32 %v19_v8, %v40_v17  ;;  %p74_p2 = scmp.lt.s32.totalorder %s72_s14, %s68_s13 }
   0x8   :  { %p75_p3 = por %p74_p2, %p73_p1 }
   0xa   :  { %p76_p4 = pnand %p75_p3, %p69_p0 }
  0x1a   :  { %22 = vperm.xlu0 %63, %v20_v3  }
  0x91   :  { %v16_v4 = vpop.xlane.xlu0 %15 }
  0x92   :  { %v17_v5 = vsub.f32 %v12_v0, %v16_v4 }
  0x94   :  { %v26_v7 = vmul.f32 1.442695, %v17_v5 }
  0x96   :  { %64 = vpow2.f32 %v26_v7 }
  0x99   :  { %v23_v9 = vpop.permute.xlu0 %22 }
  0x9a   :  { %vm24_vm1 = vcmp.eq.s32.totalorder %v19_v8, %v23_v9 }
  0x9b   :  { %v25_v11 = vsel %vm24_vm1, 0.90625, %v93_v10 }
  0x9c   :  { %v31_v14 = vmul.f32 %v25_v11, %v17_v5 }
  0x9e   :  { %v32_v15 = vsel %vm13_vm0, %v31_v14, 0.0 }
  0xa0   :  { %v65_v12 = vpop.eup %64 }
  0xa1   :  { %v28_v13 = vsel %vm13_vm0, %v65_v12, 0.0 }
  0xa2   :  { %29 = vadd.xlane.f32.xlu1 %v28_v13 }
  0xa6   :  { %33 = vadd.xlane.f32.xlu1 %v32_v15 }
 0x12f   :  { %v30_v16 = vpop.xlane.xlu1 %29 }
 0x130   :  { %66 = vlog2.f32 %v30_v16 }
 0x133   :  { %v34_v21 = vpop.xlane.xlu1 %33 }
 0x13a   :  { %v67_v18 = vpop.eup %66 }
 0x13b   :  { %v36_v19 = vmul.f32 0.6931472, %v67_v18 }
 0x13d   :  { %v37_v22 = vsub.f32 %v36_v19, %v34_v21 }
 0x13f   :  { %v42_v23 = vrot.slane %v37_v22, %v41_v20 }
 0x141   :  { %45 = vst.msk [vmem:[#allocation2] sm:$0x1] %vm44_vm2, %v42_v23 }
 0x142   :  { %79 = shalt.err (!%p76_p4)
}
 0x143   :  { %s80_s17 = scalar_lea.hbm %s133_s2, 16 }
 0x144   :  { %p81_p5 = scmp.ne.s32.totalorder %s133_s2, %s80_s17  ;;  %p84_p6 = scmp.lt.u32.totalorder %s80_s17, %s133_s2 }
 0x146   :  { %p86_p7 = pnand %p84_p6, %p81_p5 }
 0x148   :  { %89 = shalt.err (!%p86_p7)
}
 0x149   :  { %55 = dma.vmem_to_hbm [thread:$0]  %s53_s1, 16, %s133_s2, [#allocation3]  }
 0x14a   :  { %90 = dma.done.wait [#allocation3], 16  }
 0x14b   :  { %91 = vsyncadd [#allocation3], 4294967280 }
 0x14c   :  { %59 = vsyncpa [#allocation3], 1 }

</bundles_post_ra>
